<compile_context>
chip_gen: v5e
topology: v5e:2x2
jax: 0.10.0
libtpu: 0.0.40
codegen_flags: <defaults>
</compile_context>

<pallas_src>
import jax
import jax.numpy as jnp
from jax.experimental import pallas as pl
from jax.experimental.pallas import tpu as pltpu

BN_EPS = 1e-5


def _round_up(x, m):
    return ((x + m - 1) // m) * m


def _cdiv(a, b):
    return (a + b - 1) // b


def _pick_config(N, M, C, Cp, io_bytes, cw_bytes, fused, block_budget):
    """Choose (batch-per-block, spatial tile) fitting the VMEM block budget."""

    def est(nb, t):
        if fused:
            w_elems = 4 * Cp * C + (2 * Cp) * (2 * Cp) + Cp * Cp
        else:
            w_elems = 4 * C * C + 3 * C * C
        w_bytes = 2 * w_elems * cw_bytes                 # double-buffered weight windows
        blocks = 2 * nb * (C + 4 * C) * t * io_bytes     # double-buffered in + out blocks
        work = 8 * Cp * t * 4                            # live f32 intermediates (one batch elem)
        return w_bytes + blocks + work

    tile = min(1024, _round_up(M, 128))
    while tile > 128 and est(1, tile) > block_budget:
        tile = max(128, _round_up(tile // 2, 128))

    n_m = _cdiv(M, tile)
    nb = 1
    if tile < 512 and N > 1:
        nb = min(N, max(1, 512 // tile))
        # keep at least 2 grid steps when the problem has them (v7x has 2 TensorCores)
        while nb > 1 and (_cdiv(N, nb) * n_m < 2) and (N * n_m >= 2):
            nb -= 1
        while nb > 1 and est(nb, tile) > block_budget:
            nb -= 1
    return nb, tile, est(nb, tile)


def _make_kernel(C, Cp, nb, fused, compute_dtype):
    """Build the kernel body (all shapes/dtypes are static at trace time)."""

    def fused_kernel(x_ref, wf_ref, w12_ref, w2c_ref, out_ref):
        # x_ref: [nb, C, T]; wf: [4Cp, C]; w12: [2Cp, 2Cp]; w2c: [Cp, Cp]; out: [nb, 4C, T]
        odt = out_ref.dtype
        for b in range(nb):  # static unroll over the batch sub-block
            x = x_ref[b].astype(compute_dtype)                                   # [C, T]
            y = jnp.maximum(
                jnp.dot(wf_ref[...], x, preferred_element_type=jnp.float32), 0.0)  # [4Cp, T]
            # store branch0 / branch_pool right away (shortens live ranges)
            out_ref[b, 0:C, :] = y[0:C].astype(odt)
            out_ref[b, 3 * C:4 * C, :] = y[3 * Cp:3 * Cp + C].astype(odt)
            # tails: [h1; pad; h2; pad] against block-diag([w1b, w2b])
            h = y[Cp:3 * Cp].astype(compute_dtype)                               # [2Cp, T]
            x12 = jnp.maximum(
                jnp.dot(w12_ref[...], h, preferred_element_type=jnp.float32), 0.0)  # [2Cp, T]
            out_ref[b, C:2 * C, :] = x12[0:C].astype(odt)                        # branch1
            t2 = x12[Cp:2 * Cp].astype(compute_dtype)                            # [Cp, T]
            x2 = jnp.maximum(
                jnp.dot(w2c_ref[...], t2, preferred_element_type=jnp.float32), 0.0)  # [Cp, T]
            out_ref[b, 2 * C:3 * C, :] = x2[0:C].astype(odt)                     # branch2

    def sep_kernel(x_ref, wf_ref, wt_ref, out_ref):
        # x_ref: [nb, C, T]; wf: [4C, C]; wt: [3, C, C] = (w1b, w2b, w2c); out: [nb, 4C, T]
        odt = out_ref.dtype
        for b in range(nb):
            x = x_ref[b].astype(compute_dtype)
            y = jnp.maximum(
                jnp.dot(wf_ref[...], x, preferred_element_type=jnp.float32), 0.0)   # [4C, T]
            out_ref[b, 0:C, :] = y[0:C].astype(odt)
            out_ref[b, 3 * C:4 * C, :] = y[3 * C:4 * C].astype(odt)
            h1 = y[C:2 * C].astype(compute_dtype)
            h2 = y[2 * C:3 * C].astype(compute_dtype)
            x1 = jnp.maximum(
                jnp.dot(wt_ref[0], h1, preferred_element_type=jnp.float32), 0.0)
            out_ref[b, C:2 * C, :] = x1.astype(odt)
            t2 = jnp.maximum(
                jnp.dot(wt_ref[1], h2, preferred_element_type=jnp.float32), 0.0
            ).astype(compute_dtype)
            x2 = jnp.maximum(
                jnp.dot(wt_ref[2], t2, preferred_element_type=jnp.float32), 0.0)
            out_ref[b, 2 * C:3 * C, :] = x2.astype(odt)

    return fused_kernel if fused else sep_kernel


def inception_a(x_nchw, weights):
    """x_nchw: [N, C, H, W]; weights: dict of 7 conv weights each [C, C, 1, 1]."""
    N, C, H, W = x_nchw.shape
    dtype = x_nchw.dtype
    M = H * W

    is_bf16 = jnp.dtype(dtype) == jnp.dtype(jnp.bfloat16)
    compute_dtype = jnp.bfloat16 if is_bf16 else jnp.float32
    io_bytes = jnp.dtype(dtype).itemsize
    cw_bytes = jnp.dtype(compute_dtype).itemsize

    sub = 16 if is_bf16 else 8                 # sublane packing of the compute dtype
    Cp = _round_up(C, sub)                     # sublane-aligned per-branch channel block
    fused = (C < 128) or (Cp != C)             # fuse tails when the MXU would be underfilled

    inv_std = 1.0 / jnp.sqrt(jnp.float32(BN_EPS))   # BN(mean=0, var=0) scale, folded into W

    def mat(name):
        # [Cout, Cin, 1, 1] -> [Cout, Cin], BN scale folded in (relu(c*y) = c*relu(y), c>0)
        return weights[name].reshape(C, C).astype(jnp.float32) * inv_std

    if fused:
        wf = jnp.zeros((4 * Cp, C), jnp.float32)
        for i, k in enumerate(("b0", "b1a", "b2a", "bp")):
            wf = wf.at[i * Cp:i * Cp + C].set(mat(k))
        w12 = jnp.zeros((2 * Cp, 2 * Cp), jnp.float32)
        w12 = w12.at[0:C, 0:C].set(mat("b1b"))
        w12 = w12.at[Cp:Cp + C, Cp:Cp + C].set(mat("b2b"))
        w2c = jnp.zeros((Cp, Cp), jnp.float32)
        w2c = w2c.at[0:C, 0:C].set(mat("b2c"))
        w_args = (wf.astype(compute_dtype), w12.astype(compute_dtype),
                  w2c.astype(compute_dtype))
        w_specs = [
            pl.BlockSpec((4 * Cp, C), lambda n, j: (0, 0)),
            pl.BlockSpec((2 * Cp, 2 * Cp), lambda n, j: (0, 0)),
            pl.BlockSpec((Cp, Cp), lambda n, j: (0, 0)),
        ]
    else:
        wf = jnp.concatenate([mat("b0"), mat("b1a"), mat("b2a"), mat("bp")], axis=0)
        wt = jnp.stack([mat("b1b"), mat("b2b"), mat("b2c")], axis=0)
        w_args = (wf.astype(compute_dtype), wt.astype(compute_dtype))
        w_specs = [
            pl.BlockSpec((4 * C, C), lambda n, j: (0, 0)),
            pl.BlockSpec((3, C, C), lambda n, j: (0, 0, 0)),
        ]

    # Generation-aware VMEM budgeting (v7x: 64 MiB/TC, v5e/v6e: 128 MiB).
    try:
        vmem_cap = int(pltpu.get_tpu_info().vmem_capacity_bytes)
    except Exception:
        vmem_cap = 64 << 20
    block_budget = int(0.40 * vmem_cap)
    nb, tile, est_bytes = _pick_config(N, M, C, Cp, io_bytes, cw_bytes, fused, block_budget)
    vmem_limit = int(min(0.65 * vmem_cap, max(32 << 20, est_bytes + (12 << 20))))

    grid = (_cdiv(N, nb), _cdiv(M, tile))
    x3 = x_nchw.reshape(N, C, M)               # free reshape, stays NCHW in HBM

    kernel = _make_kernel(C, Cp, nb, fused, compute_dtype)

    out = pl.pallas_call(
        kernel,
        out_shape=jax.ShapeDtypeStruct((N, 4 * C, M), dtype),
        grid_spec=pltpu.PrefetchScalarGridSpec(
            num_scalar_prefetch=0,
            grid=grid,
            in_specs=[pl.BlockSpec((nb, C, tile), lambda n, j: (n, 0, j))] + w_specs,
            out_specs=pl.BlockSpec((nb, 4 * C, tile), lambda n, j: (n, 0, j)),
        ),
        compiler_params=pltpu.CompilerParams(
            dimension_semantics=("parallel", "parallel"),
            vmem_limit_bytes=vmem_limit,
        ),
    )(x3, *w_args)

    return out.reshape(N, 4 * C, H, W)


def _reference(x_nchw, weights):
    """Pure-JAX reference for correctness checking."""
    inv_std = 1.0 / jnp.sqrt(jnp.float32(BN_EPS))
    x = x_nchw.astype(jnp.float32)
    C = x.shape[1]

    def basic(v, w):
        y = jnp.einsum("nchw,oc->nohw", v, w.reshape(C, C).astype(jnp.float32))
        return jnp.maximum(y * inv_std, 0.0)

    x0 = basic(x, weights["b0"])
    x1 = basic(basic(x, weights["b1a"]), weights["b1b"])
    x2 = basic(basic(basic(x, weights["b2a"]), weights["b2b"]), weights["b2c"])
    xp = basic(x, weights["bp"])
    return jnp.concatenate([x0, x1, x2, xp], axis=1).astype(x_nchw.dtype)


def _make_inputs(key, N, C, H, W, dtype):
    names = ("b0", "b1a", "b1b", "b2a", "b2b", "b2c", "bp")
    keys = jax.random.split(key, 1 + len(names))
    x = jax.random.normal(keys[0], (N, C, H, W), dtype=dtype)
    weights = {nm: jax.random.normal(k, (C, C, 1, 1), dtype=jnp.float32)
               for nm, k in zip(names, keys[1:])}
    return x, weights


if __name__ == "__main__":
    # Primary check: small shapes (fused-tail / sublane-padded path).
    x, weights = _make_inputs(jax.random.PRNGKey(0), 2, 4, 16, 16, jnp.float32)
    out = jax.block_until_ready(inception_a(x, weights))
    ref = jax.block_until_ready(_reference(x, weights))
    assert out.shape == (2, 16, 16, 16), out.shape
    assert jnp.allclose(out, ref, rtol=1e-3, atol=1e-2), "mismatch vs reference (small C)"

    # Secondary check: channel-aligned path (separate tail matmuls, C >= 128).
    x2, weights2 = _make_inputs(jax.random.PRNGKey(1), 1, 128, 16, 16, jnp.float32)
    out2 = jax.block_until_ready(inception_a(x2, weights2))
    ref2 = jax.block_until_ready(_reference(x2, weights2))
    assert out2.shape == (1, 512, 16, 16), out2.shape
    rel_err = jnp.max(jnp.abs(out2 - ref2)) / (jnp.max(jnp.abs(ref2)) + 1e-6)
    assert rel_err < 1e-3, f"mismatch vs reference (aligned C), rel_err={rel_err}"

    print("KERNEL_OK")
</pallas_src>

<mosaic_0001>
module attributes {stable_mosaic.version = 11 : i64} {
  func.func @fused_kernel(%arg0: i32, %arg1: i32, %arg2: memref<1x4x256xf32, #tpu.memory_space<vmem>>, %arg3: memref<32x4xf32, #tpu.memory_space<vmem>>, %arg4: memref<16x16xf32, #tpu.memory_space<vmem>>, %arg5: memref<8x8xf32, #tpu.memory_space<vmem>>, %arg6: memref<1x16x256xf32, #tpu.memory_space<vmem>>) attributes {dimension_semantics = [#tpu.dimension_semantics<parallel>, #tpu.dimension_semantics<parallel>], iteration_bounds = array<i64: 2, 1>, scalar_prefetch = 0 : i64, scratch_operands = 0 : i64, tpu.core_type = #tpu.core_type<tc>, window_params = [{transform_indices = @transform_0, window_bounds = array<i64: 1, 4, 256>}, {pipeline_mode = #tpu.pipeline_mode<synchronous>, transform_indices = @transform_1, window_bounds = array<i64: 32, 4>}, {pipeline_mode = #tpu.pipeline_mode<synchronous>, transform_indices = @transform_2, window_bounds = array<i64: 16, 16>}, {pipeline_mode = #tpu.pipeline_mode<synchronous>, transform_indices = @transform_3, window_bounds = array<i64: 8, 8>}, {transform_indices = @transform_4, window_bounds = array<i64: 1, 16, 256>}]} {
    %c0 = arith.constant 0 : index
    %c0_0 = arith.constant 0 : index
    %c0_1 = arith.constant 0 : index
    %0 = vector.load %arg2[%c0, %c0_0, %c0_1] : memref<1x4x256xf32, #tpu.memory_space<vmem>>, vector<1x4x256xf32>
    %1 = vector.shape_cast %0 : vector<1x4x256xf32> to vector<4x256xf32>
    %c0_2 = arith.constant 0 : index
    %c0_3 = arith.constant 0 : index
    %2 = vector.load %arg3[%c0_2, %c0_3] : memref<32x4xf32, #tpu.memory_space<vmem>>, vector<32x4xf32>
    %cst = arith.constant dense<0.000000e+00> : vector<32x256xf32>
    %3 = tpu.matmul %2, %1, %cst {dimension_numbers = #tpu.dot_dimension_numbers<[1], [0], [0], [1], [0, 0, 1, 1], [], []>} : vector<32x4xf32>, vector<4x256xf32>, vector<32x256xf32> -> vector<32x256xf32>
    %cst_4 = arith.constant 0.000000e+00 : f32
    %4 = vector.broadcast %cst_4 : f32 to vector<32x256xf32>
    %5 = arith.maximumf %3, %4 : vector<32x256xf32>
    %6 = vector.extract_strided_slice %5 {offsets = [0, 0], sizes = [4, 256], strides = [1, 1]} : vector<32x256xf32> to vector<4x256xf32>
    %c0_5 = arith.constant 0 : index
    %c0_6 = arith.constant 0 : index
    %c0_7 = arith.constant 0 : index
    %7 = vector.load %arg6[%c0_5, %c0_6, %c0_7] : memref<1x16x256xf32, #tpu.memory_space<vmem>>, vector<1x4x256xf32>
    %8 = vector.shape_cast %7 : vector<1x4x256xf32> to vector<4x256xf32>
    %9 = vector.shape_cast %6 : vector<4x256xf32> to vector<1x4x256xf32>
    tpu.vector_store %arg6[%c0_5, %c0_6, %c0_7], %9 {strides = array<i32>} : memref<1x16x256xf32, #tpu.memory_space<vmem>>, vector<1x4x256xf32>,
    %10 = vector.extract_strided_slice %5 {offsets = [24, 0], sizes = [4, 256], strides = [1, 1]} : vector<32x256xf32> to vector<4x256xf32>
    %c0_8 = arith.constant 0 : index
    %c12 = arith.constant 12 : index
    %c0_9 = arith.constant 0 : index
    %11 = vector.load %arg6[%c0_8, %c12, %c0_9] : memref<1x16x256xf32, #tpu.memory_space<vmem>>, vector<1x4x256xf32>
    %12 = vector.shape_cast %11 : vector<1x4x256xf32> to vector<4x256xf32>
    %13 = vector.shape_cast %10 : vector<4x256xf32> to vector<1x4x256xf32>
    tpu.vector_store %arg6[%c0_8, %c12, %c0_9], %13 {strides = array<i32>} : memref<1x16x256xf32, #tpu.memory_space<vmem>>, vector<1x4x256xf32>,
    %14 = vector.extract_strided_slice %5 {offsets = [8, 0], sizes = [16, 256], strides = [1, 1]} : vector<32x256xf32> to vector<16x256xf32>
    %c0_10 = arith.constant 0 : index
    %c0_11 = arith.constant 0 : index
    %15 = vector.load %arg4[%c0_10, %c0_11] : memref<16x16xf32, #tpu.memory_space<vmem>>, vector<16x16xf32>
    %cst_12 = arith.constant dense<0.000000e+00> : vector<16x256xf32>
    %16 = tpu.matmul %15, %14, %cst_12 {dimension_numbers = #tpu.dot_dimension_numbers<[1], [0], [0], [1], [0, 0, 1, 1], [], []>} : vector<16x16xf32>, vector<16x256xf32>, vector<16x256xf32> -> vector<16x256xf32>
    %cst_13 = arith.constant 0.000000e+00 : f32
    %17 = vector.broadcast %cst_13 : f32 to vector<16x256xf32>
    %18 = arith.maximumf %16, %17 : vector<16x256xf32>
    %19 = vector.extract_strided_slice %18 {offsets = [0, 0], sizes = [4, 256], strides = [1, 1]} : vector<16x256xf32> to vector<4x256xf32>
    %c0_14 = arith.constant 0 : index
    %c4 = arith.constant 4 : index
    %c0_15 = arith.constant 0 : index
    %20 = vector.load %arg6[%c0_14, %c4, %c0_15] : memref<1x16x256xf32, #tpu.memory_space<vmem>>, vector<1x4x256xf32>
    %21 = vector.shape_cast %20 : vector<1x4x256xf32> to vector<4x256xf32>
    %22 = vector.shape_cast %19 : vector<4x256xf32> to vector<1x4x256xf32>
    tpu.vector_store %arg6[%c0_14, %c4, %c0_15], %22 {strides = array<i32>} : memref<1x16x256xf32, #tpu.memory_space<vmem>>, vector<1x4x256xf32>,
    %23 = vector.extract_strided_slice %18 {offsets = [8, 0], sizes = [8, 256], strides = [1, 1]} : vector<16x256xf32> to vector<8x256xf32>
    %c0_16 = arith.constant 0 : index
    %c0_17 = arith.constant 0 : index
    %24 = vector.load %arg5[%c0_16, %c0_17] : memref<8x8xf32, #tpu.memory_space<vmem>>, vector<8x8xf32>
    %cst_18 = arith.constant dense<0.000000e+00> : vector<8x256xf32>
    %25 = tpu.matmul %24, %23, %cst_18 {dimension_numbers = #tpu.dot_dimension_numbers<[1], [0], [0], [1], [0, 0, 1, 1], [], []>} : vector<8x8xf32>, vector<8x256xf32>, vector<8x256xf32> -> vector<8x256xf32>
    %cst_19 = arith.constant 0.000000e+00 : f32
    %26 = vector.broadcast %cst_19 : f32 to vector<8x256xf32>
    %27 = arith.maximumf %25, %26 : vector<8x256xf32>
    %28 = vector.extract_strided_slice %27 {offsets = [0, 0], sizes = [4, 256], strides = [1, 1]} : vector<8x256xf32> to vector<4x256xf32>
    %c0_20 = arith.constant 0 : index
    %c8 = arith.constant 8 : index
    %c0_21 = arith.constant 0 : index
    %29 = vector.load %arg6[%c0_20, %c8, %c0_21] : memref<1x16x256xf32, #tpu.memory_space<vmem>>, vector<1x4x256xf32>
    %30 = vector.shape_cast %29 : vector<1x4x256xf32> to vector<4x256xf32>
    %31 = vector.shape_cast %28 : vector<4x256xf32> to vector<1x4x256xf32>
    tpu.vector_store %arg6[%c0_20, %c8, %c0_21], %31 {strides = array<i32>} : memref<1x16x256xf32, #tpu.memory_space<vmem>>, vector<1x4x256xf32>,
    return
  }
  func.func @transform_0(%arg0: i32, %arg1: i32) -> (i32, i32, i32) {
    %c0_i32 = arith.constant 0 : i32
    %c0_i32_0 = arith.constant 0 : i32
    return %arg0, %c0_i32, %arg1 : i32, i32, i32
  }
  func.func @transform_1(%arg0: i32, %arg1: i32) -> (i32, i32) {
    %c0_i32 = arith.constant 0 : i32
    %c0_i32_0 = arith.constant 0 : i32
    %c0_i32_1 = arith.constant 0 : i32
    return %c0_i32, %c0_i32_0 : i32, i32
  }
  func.func @transform_2(%arg0: i32, %arg1: i32) -> (i32, i32) {
    %c0_i32 = arith.constant 0 : i32
    %c0_i32_0 = arith.constant 0 : i32
    %c0_i32_1 = arith.constant 0 : i32
    return %c0_i32, %c0_i32_0 : i32, i32
  }
  func.func @transform_3(%arg0: i32, %arg1: i32) -> (i32, i32) {
    %c0_i32 = arith.constant 0 : i32
    %c0_i32_0 = arith.constant 0 : i32
    %c0_i32_1 = arith.constant 0 : i32
    return %c0_i32, %c0_i32_0 : i32, i32
  }
  func.func @transform_4(%arg0: i32, %arg1: i32) -> (i32, i32, i32) {
    %c0_i32 = arith.constant 0 : i32
    %c0_i32_0 = arith.constant 0 : i32
    return %arg0, %c0_i32, %arg1 : i32, i32, i32
  }
}

</mosaic_0001>

<bundles_post_ra>
// kernel: tpu_custom_call.1
= control target key start
LH: loop header
LB: loop body
LE: loop exit
PB: predicated region body
PF: predicated region fallthrough
CT: control target
= control target key end

     0   :  { %9 = vsyncpa [#allocation3], 0  ;;  %s954_s0 = inlined_call_operand.vmem [shape: f32[2,4,256], index: 0, kind: input, shape index: {}]   ;;  %s955_s1 = inlined_call_operand.vmem [shape: f32[32,4], index: 1, kind: input, shape index: {}]   ;;  %s956_s2 = inlined_call_operand.vmem [shape: f32[16,16], index: 2, kind: input, shape index: {}]   ;;  %s957_s3 = inlined_call_operand.hbm [shape: f32[8,8], index: 3, kind: input, shape index: {}]   ;;  %s958_s4 = inlined_call_operand.hbm [shape: f32[2,16,256], index: 4, kind: output, shape index: {}]  }
   0x1   :  { %10 = vsyncpa [#allocation4], 0 }
   0x2   :  { %12 = vsyncpa [#allocation4 + $0x1], 0  ;;  %s813_s15 = smov 0   ;;  %s815_s16 = smov 0  }
   0x3   :  { %s817_s17 = smov 0   ;;  %s819_s18 = smov 0  }
   0x4   :  { %s821_s19 = smov 0   ;;  %s823_s20 = smov 0  }
   0x5 LB: > { %s570_s21 = sadd.s32 4294967295, %s783_s20   ;;  %s571_s22 = sadd.s32 4294967294, %s783_s20   ;;  %s783_s20 = sphi %s823_s20, %s18_s20   ;;  %s779_s19 = sphi %s821_s19, %s965_s19   ;;  %s775_s18 = sphi %s819_s18, %s964_s18   ;;  %s771_s17 = sphi %s817_s17, %s963_s17   ;;  %s767_s16 = sphi %s815_s16, %s962_s16   ;;  %s763_s15 = sphi %s813_s15, %s961_s15  }
   0x6   : > { %s30_s23 = sadd.s32 1, %s779_s19  ;;  %s130_s24 = sadd.s32 1, %s771_s17 }
   0x7   : > { %p32_p0 = scmp.ge.s32.totalorder %s30_s23, 2  ;;  %p140_p1 = scmp.ne.s32.totalorder %s771_s17, %s767_s16 }
   0x8   : > { %p141_p2 = scmp.eq.s32.totalorder %s570_s21, 1  ;;  %p146_p3 = scmp.ne.s32.totalorder %s767_s16, %s763_s15 }
   0x9   : > { %s967_s23 = smov (%p32_p0, %s30_s23), 0  ;;  %p147_p5 = scmp.eq.s32.totalorder %s571_s22, 1 }
   0xa   : > { %p853_p4 = por %p141_p2, %p140_p1  ;;  %s125_s26 = ssub.s32 %s779_s19, %s967_s23 }
   0xb   : > { %p572_p6 = scmp.ge.s32.totalorder %s783_s20, 1  ;;  %p128_p7 = scmp.eq.s32.totalorder %s125_s26, 0 }
   0xc   : > { %p860_p8 = por %p147_p5, %p146_p3  ;;  %p154_p9 = scmp.lt.s32.totalorder %s783_s20, 3 }
   0xd   : > { %s866_s28 = scalar_select %p128_p7, %s771_s17, %s130_s24  }
   0xe   : > { %p155_p10 = pnand %p572_p6, %p154_p9  ;;  %p617_p11 = scmp.eq.s32.totalorder %s570_s21, 0 }
   0xf   : > { %s172_s5 = sshll.u32 %s957_s3, 4  ;;  %s785_s6 = smov [#allocation2]   ;;  %s173_s5 = int_to_ptr.hbm [resolvable:$true] %s172_s5 }
  0x10   : > { %p609_p12 = pneg %p155_p10  ;;  %s174_s7 = sshll.u32 %s785_s6, 4  ;;  %s175_s7 = int_to_ptr.vmem [resolvable:$true] %s174_s7 }
  0x11   : > { %200 = sbr.rel (%p155_p10) target bundleno = 468 (0x1d4), region = 36 }
  0x12   : > { %p610_p13 = pnand %p617_p11, %p609_p12 }
  0x14   : > { %612 = dma.hbm_to_vmem [thread:$0]  (!%p610_p13), %s173_s5, 128, %s175_s7, [#allocation3]  }
  0x16   : > { %754 = dma.done.wait (%p617_p11), [#allocation3], 128  }
  0x17   : > { %756 = vsyncadd (%p617_p11), [#allocation3], 4294967168  ;;  %p232_p0 = scmp.lt.s32.totalorder %s775_s18, 1  ;;  %vm264_vm0 = vcmask 1043456   ;;  %v243_v1 = vld [vmem:[%s955_s1] sm:$0xff]  ;;  %vm251_vm1 = vcmask 31744  }
  0x18   : > { %v244_v4 = vld [vmem:[%s955_s1 + $0x8] sm:$0xff]  ;;  %v245_v5 = vld [vmem:[%s955_s1 + $0x10] sm:$0xff]  ;;  %s228_s29 = sand.u32 1, %s767_s16   ;;  %v345_v18 = vld [vmem:[%s956_s2] sm:$0xff]  ;;  %vm347_vm2 = vcmask 130048   ;;  %vm413_vm3 = vcmask 64512  }
  0x19   : > { %s233_s8 = scalar_select %p232_p0, %s775_s18, 1  ;;  %v346_v19 = vld [vmem:[%s956_s2 + $0x8] sm:$0xff]  ;;  %v246_v20 = vld [vmem:[%s955_s1 + $0x18] sm:$0xff] }
  0x1a   : > { %s577_s30 = sshll.u32 %s228_s29, 5  ;;  %v412_v31 = vld [vmem:[#allocation2] sm:$0xff]  ;;  %s462_s26 = scalar_lea.sflag [#allocation4], %s228_s29 }
  0x1b   : > { %s601_s9 = sshll.u32 %s233_s8, 3  ;;  %s894_s5 = scalar_lea.vmem [#allocation5], %s577_s30 }
  0x1c   : > { %s239_s12 = scalar_lea.vmem %s954_s0, %s601_s9  ;;  %s476_s22 = sshll.u32 %s894_s5, 4  ;;  %s477_s22 = int_to_ptr.vmem [resolvable:$true] %s476_s22 }
  0x1d   : > { %v242_v0 = vld [vmem:[%s239_s12] sm:$0xff]  ;;  %s602_s12 = sshll.u32 %s775_s18, 5  ;;  %s721_s8 = scalar_lea.hbm %s958_s4, 64 }
  0x1e   : > { %248 = vst [vmem:[#allocation1] ss:$2 sm:$0xff] %v242_v0  ;;  %s475_s21 = scalar_lea.hbm %s958_s4, %s602_s12 }
  0x1f   : > { %s478_s24 = sshll.u32 %s475_s21, 4  ;;  %s479_s24 = int_to_ptr.hbm [resolvable:$true] %s478_s24 }
  0x20   : > { %s715_s30 = sshra.s32 %s479_s24, 4  ;;  %s716_s30 = int_to_ptr.hbm [resolvable:$true] %s715_s30 }
  0x21   : > { %s717_s18 = scalar_lea.hbm %s716_s30, 32  ;;  %p722_p5 = scmp.lt.s32.totalorder %s716_s30, %s958_s4 }
  0x22   : > { %p718_p1 = scmp.ne.s32.totalorder %s716_s30, %s717_s18  ;;  %p723_p6 = scmp.lt.s32.totalorder %s721_s8, %s717_s18 }
  0x24   : > { %p719_p2 = pnand %p718_p1, %p853_p4  ;;  %p724_p7 = por %p723_p6, %p722_p5 }
  0x25   : > { %v249_v2 = vld.sshfl [vmem:[#allocation1] sm:$0xff pattern:$0x75316420]  ;;  %v250_v3 = vld.sshfl [vmem:[#allocation1 + $0x8] sm:$0xff pattern:$0x75316420] }
  0x26   : > { %580 = vmatpush.msk.msra.mxu0 %vm264_vm0, %v249_v2  ;;  %585 = vmatpush.msk.msra.mxu1 %vm264_vm0, %v250_v3  ;;  %p720_p3 = pneg %p719_p2 }
  0x27   : > { %581 = vmatmul.msk.f32.vlgmr.msra.gmra.mxu0 %vm251_vm1, %v243_v1  ;;  %586 = vmatmul.msk.f32.vlgmr.msra.gmra.mxu1 %vm251_vm1, %v243_v1 }
  0x28   : > { %p725_p9 = pnand %p724_p7, %p720_p3 }
  0x2f   : > { %582 = vmatmul.msk.f32.gmra.mxu0 %vm251_vm1, %v244_v4  ;;  %587 = vmatmul.msk.f32.gmra.mxu1 %vm251_vm1, %v244_v4 }
  0x37   : > { %583 = vmatmul.msk.f32.gmra.mxu0 %vm251_vm1, %v245_v5  ;;  %588 = vmatmul.msk.f32.gmra.mxu1 %vm251_vm1, %v245_v5 }
  0x3f   : > { %584 = vmatmul.msk.f32.gmra.mxu0 %vm251_vm1, %v246_v20  ;;  %589 = vmatmul.msk.f32.gmra.mxu1 %vm251_vm1, %v246_v20 }
  0xa4   : > { %v286_v6 = vpop.f32.mrf.mxu0  ;;  %v315_v7 = vpop.f32.mrf.mxu1 }
  0xa5   : > { %v327_v8 = vmax.f32 %v286_v6, 0.0  ;;  %v328_v9 = vmax.f32 %v315_v7, 0.0 }
  0xa7   : > { %335 = vst [vmem:[%s894_s5] sm:$0xf] %v327_v8 }
  0xa8   : > { %336 = vst [vmem:[%s894_s5 + $0x8] sm:$0xf] %v328_v9 }
  0xac   : > { %v289_v10 = vpop.f32.mrf.mxu0  ;;  %v318_v11 = vpop.f32.mrf.mxu1 }
  0xad   : > { %v329_v16 = vmax.f32 %v289_v10, 0.0  ;;  %v330_v17 = vmax.f32 %v318_v11, 0.0 }
  0xb4   : > { %v292_v12 = vpop.f32.mrf.mxu0  ;;  %v321_v13 = vpop.f32.mrf.mxu1 }
  0xb5   : > { %v331_v14 = vmax.f32 %v292_v12, 0.0  ;;  %v332_v15 = vmax.f32 %v321_v13, 0.0 }
  0xb7   : > { %368 = vmatpush.msra.mxu2 %v331_v14  ;;  %391 = vmatpush.msra.mxu3 %v332_v15 }
  0xb9   : > { %369 = vmatpush.msra.mxu2 %v329_v16  ;;  %392 = vmatpush.msra.mxu3 %v330_v17 }
  0xba   : > { %590 = vmatmul.msk.f32.vlgmr.msra.gmra.mxu2 %vm347_vm2, %v345_v18  ;;  %592 = vmatmul.msk.f32.vlgmr.msra.gmra.mxu3 %vm347_vm2, %v345_v18 }
  0xbc   : > { %v295_v32 = vpop.f32.mrf.mxu0  ;;  %v324_v33 = vpop.f32.mrf.mxu1 }
  0xbd   : > { %v333_v34 = vmax.f32 %v295_v32, 0.0  ;;  %v334_v35 = vmax.f32 %v324_v33, 0.0 }
  0xbf   : > { %v339_v36 = vrot.slane %v333_v34, 4  ;;  %v340_v37 = vrot.slane %v334_v35, 4 }
  0xc1   : > { %343 = vst [vmem:[%s894_s5 + $0x10] sm:$0xf0] %v339_v36 }
  0xc2   : > { %591 = vmatmul.msk.f32.gmra.mxu2 %vm347_vm2, %v346_v19  ;;  %593 = vmatmul.msk.f32.gmra.mxu3 %vm347_vm2, %v346_v19  ;;  %344 = vst [vmem:[%s894_s5 + $0x18] sm:$0xf0] %v340_v37 }
 0x13d   : > { %v371_v21 = vpop.f32.mrf.mxu2  ;;  %v394_v22 = vpop.f32.mrf.mxu3 }
 0x13e   : > { %v400_v23 = vmax.f32 %v371_v21, 0.0  ;;  %v401_v24 = vmax.f32 %v394_v22, 0.0 }
 0x140   : > { %v406_v25 = vrot.slane %v400_v23, 4  ;;  %v407_v26 = vrot.slane %v401_v24, 4 }
 0x142   : > { %410 = vst [vmem:[%s894_s5] sm:$0xf0] %v406_v25 }
 0x143   : > { %411 = vst [vmem:[%s894_s5 + $0x8] sm:$0xf0] %v407_v26 }
 0x145   : > { %v374_v27 = vpop.f32.mrf.mxu2  ;;  %v397_v28 = vpop.f32.mrf.mxu3 }
 0x146   : > { %v402_v29 = vmax.f32 %v374_v27, 0.0  ;;  %v403_v30 = vmax.f32 %v397_v28, 0.0 }
 0x148   : > { %432 = vmatpush.msrb.mxu2 %v402_v29  ;;  %452 = vmatpush.msrb.mxu3 %v403_v30 }
 0x149   : > { %594 = vmatmul.msk.f32.vlgmr.msrb.gmra.mxu2 %vm413_vm3, %v412_v31  ;;  %595 = vmatmul.msk.f32.vlgmr.msrb.gmra.mxu3 %vm413_vm3, %v412_v31 }
 0x1cc   : > { %v434_v38 = vpop.f32.mrf.mxu2  ;;  %v454_v39 = vpop.f32.mrf.mxu3 }
 0x1cd   : > { %v457_v40 = vmax.f32 %v434_v38, 0.0  ;;  %v458_v41 = vmax.f32 %v454_v39, 0.0 }
 0x1cf   : > { %459 = vst [vmem:[%s894_s5 + $0x10] sm:$0xf] %v457_v40 }
 0x1d0   : > { %460 = vst [vmem:[%s894_s5 + $0x18] sm:$0xf] %v458_v41 }
 0x1d1   : > { %728 = shalt.err (!%p725_p9)
}
 0x1d2   : > { %s786_s29 = smov 256   ;;  %s787_s5 = smov 16  }
 0x1d3   : > { %607 = dma.vmem_to_hbm [thread:$0]  (%p853_p4), %s477_s22, 512, %s479_s24, %s462_s26, %s786_s29, %s786_s29, %s787_s5  }
 0x1d4 PF: > { %p619_p10 = scmp.ge.s32.totalorder %s783_s20, 2  ;;  %s493_s11 = sand.u32 1, %s763_s15  }
 0x1d5   : > { %s494_s12 = scalar_lea.sflag [#allocation4], %s493_s11 }
 0x1d6   : > { %p614_p11 = pnand %p619_p10, %p860_p8 }
 0x1d8   : > { %p615_p12 = pneg %p614_p11 }
 0x1da   : > { %758 = dma.done.wait (%p615_p12), %s494_s12, 512  }
 0x1db   : > { %760 = vsyncadd (%p615_p12), %s494_s12, 4294966784  ;;  %s18_s20 = sadd.s32 1, %s783_s20   ;;  %s961_s15 = smov %s767_s16 }
 0x1dc   : > { %p15_p13 = scmp.ge.s32.totalorder %s18_s20, 4   ;;  %s962_s16 = smov %s771_s17 }
 0x1dd   : > { %s963_s17 = smov %s866_s28  ;;  %s964_s18 = smov %s779_s19 }
 0x1de   : > { %s965_s19 = smov %s967_s23  ;;  %17 = sbr.rel (!%p15_p13) target bundleno = 5 (0x5), region = 76 }
 0x1e3   :  { %500 = vsyncpa [#allocation3], 1 }
 0x1e4   :  { %502 = vsyncpa [#allocation3 + $0x1], 1 }
 0x1e5   :  { %503 = vsyncpa [#allocation4], 1 }
 0x1e6   :  { %505 = vsyncpa [#allocation4 + $0x1], 1 }

</bundles_post_ra>
